<compile_context>
chip_gen: v6e
topology: v6e:2x2x1
jax: 0.10.0
libtpu: 0.0.40
codegen_flags: <defaults>
</compile_context>

<pallas_src>
import jax
import jax.numpy as jnp
from jax.experimental import pallas as pl
from jax.experimental.pallas import tpu as pltpu


def _spatial_attention_kernel(w_ref, x_ref, o_ref):
    # w_ref : SMEM, (2,) f32        -- [w_avg / C, w_max]  (1/C pre-folded)
    # x_ref : VMEM, (TN, C, T_HW)   -- input tile, native dtype
    # o_ref : VMEM, (TN, T_HW)      -- lane/sublane-dense output tile
    w0c = w_ref[0]
    w1 = w_ref[1]
    x = x_ref[...]
    # f32 accumulation for the sum; max in native dtype, cast only the result.
    sum_pool = jnp.sum(x, axis=1, dtype=jnp.float32)        # (TN, T_HW) f32
    max_pool = jnp.max(x, axis=1).astype(jnp.float32)       # (TN, T_HW) f32
    logits = w0c * sum_pool + w1 * max_pool                 # fused 1x1 conv (2->1)
    o_ref[...] = jax.nn.sigmoid(logits).astype(o_ref.dtype)


def _round_up(x, m):
    return (x + m - 1) // m * m


def _sublane_tile(itemsize):
    # Packed sublane tile: 8 rows for 4-byte, 16 for 2-byte, 32 for 1-byte.
    return max(8, 32 // max(int(itemsize), 1))


def _vmem_params():
    """Return (tiling_budget_bytes, vmem_limit_bytes) for this chip.

    v7x has only 64 MiB VMEM per TensorCore -> conservative 16 MiB tiling
    budget and 48 MiB scoped limit.  v5e / v6e have 128 MiB -> 24 MiB budget
    and 64 MiB limit for the last few percent of HBM roofline.
    """
    try:
        cap = pltpu.get_tpu_info().vmem_capacity_bytes
    except Exception:  # unknown environment: assume the smallest (v7x) VMEM
        cap = 64 * 1024 * 1024
    if cap <= 64 * 1024 * 1024:
        return 16 * 1024 * 1024, 48 * 1024 * 1024
    return 24 * 1024 * 1024, 64 * 1024 * 1024


def _choose_tiles(N, C, HW, itemsize, vmem_budget_bytes):
    """Pick (TN, T_HW) so double-buffered in+out blocks fit the VMEM budget.

    Accounting includes sublane padding of the channel axis: each per-batch
    (C, T_HW) input slab is padded to (C_pad, T_HW) in VMEM, where C_pad is C
    rounded up to the packed sublane tile of the dtype.  The padding is never
    DMA'd from HBM, so it only costs VMEM capacity -- which this budget guards.
    """
    sub = _sublane_tile(itemsize)
    c_pad = _round_up(C, sub)
    # Double-buffered VMEM bytes per (batch row x lane) cell of a block:
    # padded input slab + output row, each x2 pipeline buffers.
    per_cell = 2 * (c_pad + 1) * itemsize

    lane_ok = (HW % 128 == 0)

    # ---- lane (spatial) tile ----
    # Start past the measured DMA-efficiency knee (>= 512 lanes) but leave
    # room for the batch tile to grow; ragged HW must take the full extent.
    t_hw = min(HW, 2048) if lane_ok else HW

    # ---- batch tile (scaled from the budget, not hard-capped) ----
    max_tn = vmem_budget_bytes // (per_cell * t_hw)
    if max_tn == 0 and lane_ok:
        # Even a single batch row busts the budget at this lane width
        # (very large padded C): shrink the lane tile first.
        t_hw = min(HW, max(128, (vmem_budget_bytes // per_cell) // 128 * 128))
        max_tn = vmem_budget_bytes // (per_cell * t_hw)
    max_tn = max(1, max_tn)

    if N <= max_tn:
        tn = N                                   # full batch in one block
    else:
        tn = max(sub, (max_tn // sub) * sub)     # packed-dense output stores
        tn = min(tn, N)

    # If the whole batch fits in one block and budget remains, grow the lane
    # tile instead (small-N / large-HW shapes).
    if lane_ok and tn == N and t_hw < HW:
        grown = (vmem_budget_bytes // (per_cell * tn)) // 128 * 128
        t_hw = min(HW, max(t_hw, grown))

    # ---- guarantee >= 2 grid steps (feeds both v7x TensorCores) ----
    if pl.cdiv(N, tn) * pl.cdiv(HW, t_hw) <= 1:
        if lane_ok and t_hw >= 256:
            t_hw = max(128, (t_hw // 2) // 128 * 128)
        elif N > sub:
            tn = max(sub, (tn // 2) // sub * sub)

    return tn, t_hw


def spatial_attention(x, conv_weight):
    """x: (N, C, H, W).  conv_weight: (1, 2, 1, 1).  Returns (N, 1, H, W)."""
    N, C, H, W = x.shape
    HW = H * W
    itemsize = jnp.dtype(x.dtype).itemsize

    x_flat = x.reshape(N, C, HW)                     # free reshape (contiguous)
    w = conv_weight.reshape(2).astype(jnp.float32)
    # Fold 1/C of the mean into the avg-pool weight on the host.
    w_fused = jnp.stack([w[0] / jnp.float32(C), w[1]])

    vmem_budget, vmem_limit = _vmem_params()
    TN, T_HW = _choose_tiles(N, C, HW, itemsize, vmem_budget)
    grid = (pl.cdiv(N, TN), pl.cdiv(HW, T_HW))

    cost = pl.CostEstimate(
        flops=3 * N * C * HW,                         # sum + max + fused conv
        transcendentals=N * HW,                       # sigmoid
        bytes_accessed=(N * C * HW + N * HW) * itemsize,
    )

    out = pl.pallas_call(
        _spatial_attention_kernel,
        out_shape=jax.ShapeDtypeStruct((N, HW), x.dtype),
        grid_spec=pltpu.PrefetchScalarGridSpec(
            num_scalar_prefetch=0,
            grid=grid,
            in_specs=[
                # 8-byte conv weight lives whole in SMEM (scalar constants).
                pl.BlockSpec(memory_space=pltpu.MemorySpace.SMEM),
                # input tile: (TN batch rows, full C, T_HW lanes).
                pl.BlockSpec((TN, C, T_HW), lambda n, s: (n, 0, s)),
            ],
            # dense (sublane x lane) output tile.
            out_specs=pl.BlockSpec((TN, T_HW), lambda n, s: (n, s)),
        ),
        compiler_params=pltpu.CompilerParams(
            dimension_semantics=("parallel", "parallel"),
            vmem_limit_bytes=vmem_limit,
        ),
        cost_estimate=cost,
    )(w_fused, x_flat)

    return out.reshape(N, 1, H, W)


def spatial_attention_ref(x, conv_weight):
    """Pure-JAX reference mirroring the PyTorch forward."""
    avg_pool = jnp.mean(x, axis=1, keepdims=True)
    max_pool = jnp.max(x, axis=1, keepdims=True)
    w = conv_weight.reshape(2)
    logits = w[0] * avg_pool + w[1] * max_pool
    return jax.nn.sigmoid(logits)


if __name__ == "__main__":
    key = jax.random.PRNGKey(0)
    kx, kw = jax.random.split(key)

    # Small NCHW input: batch=2, channels=4, spatial=16x16.
    x = jax.random.normal(kx, (2, 4, 16, 16), dtype=jnp.float32)
    # Conv2d(2 -> 1, kernel_size=1, bias=False) weight: (1, 2, 1, 1).
    conv_weight = jax.random.normal(kw, (1, 2, 1, 1), dtype=jnp.float32) * 0.5

    out = spatial_attention(x, conv_weight)
    out = jax.block_until_ready(out)

    ref = spatial_attention_ref(x, conv_weight)
    assert out.shape == (2, 1, 16, 16)
    assert jnp.allclose(out, ref, atol=1e-5, rtol=1e-5), "mismatch vs reference"

    print("KERNEL_OK")
</pallas_src>

<mosaic_0001>
module attributes {stable_mosaic.version = 11 : i64} {
  func.func @_spatial_attention_kernel(%arg0: i32, %arg1: i32, %arg2: memref<2xf32, #tpu.memory_space<smem>>, %arg3: memref<2x4x128xf32, #tpu.memory_space<vmem>>, %arg4: memref<2x128xf32, #tpu.memory_space<vmem>>) attributes {dimension_semantics = [#tpu.dimension_semantics<parallel>, #tpu.dimension_semantics<parallel>], iteration_bounds = array<i64: 1, 2>, scalar_prefetch = 0 : i64, scratch_operands = 0 : i64, tpu.core_type = #tpu.core_type<tc>, window_params = [{transform_indices = @transform_0, window_bounds = array<i64: 2>}, {transform_indices = @transform_1, window_bounds = array<i64: 2, 4, 128>}, {transform_indices = @transform_2, window_bounds = array<i64: 2, 128>}]} {
    %c0 = arith.constant 0 : index
    %0 = memref.load %arg2[%c0] : memref<2xf32, #tpu.memory_space<smem>>
    %c1 = arith.constant 1 : index
    %1 = memref.load %arg2[%c1] : memref<2xf32, #tpu.memory_space<smem>>
    %c0_0 = arith.constant 0 : index
    %c0_1 = arith.constant 0 : index
    %c0_2 = arith.constant 0 : index
    %2 = vector.load %arg3[%c0_0, %c0_1, %c0_2] : memref<2x4x128xf32, #tpu.memory_space<vmem>>, vector<2x4x128xf32>
    %cst = arith.constant dense<0.000000e+00> : vector<2x128xf32>
    %3 = vector.multi_reduction <add>, %2, %cst [1] : vector<2x4x128xf32> to vector<2x128xf32>
    %cst_3 = arith.constant dense<0xFF800000> : vector<2x128xf32>
    %4 = vector.multi_reduction <maximumf>, %2, %cst_3 [1] : vector<2x4x128xf32> to vector<2x128xf32>
    %5 = vector.broadcast %0 : f32 to vector<2x128xf32>
    %6 = arith.mulf %5, %3 : vector<2x128xf32>
    %7 = vector.broadcast %1 : f32 to vector<2x128xf32>
    %8 = arith.mulf %7, %4 : vector<2x128xf32>
    %9 = arith.addf %6, %8 : vector<2x128xf32>
    %10 = arith.negf %9 : vector<2x128xf32>
    %11 = math.exp %10 : vector<2x128xf32>
    %cst_4 = arith.constant 1.000000e+00 : f32
    %12 = vector.broadcast %cst_4 : f32 to vector<2x128xf32>
    %13 = arith.addf %12, %11 : vector<2x128xf32>
    %14 = arith.divf %12, %13 : vector<2x128xf32>
    %c0_5 = arith.constant 0 : index
    %c0_6 = arith.constant 0 : index
    %15 = vector.load %arg4[%c0_5, %c0_6] : memref<2x128xf32, #tpu.memory_space<vmem>>, vector<2x128xf32>
    tpu.vector_store %arg4[%c0_5, %c0_6], %14 {strides = array<i32>} : memref<2x128xf32, #tpu.memory_space<vmem>>, vector<2x128xf32>,
    return
  }
  func.func @transform_0(%arg0: i32, %arg1: i32) -> i32 {
    %c0_i32 = arith.constant 0 : i32
    %c0_i32_0 = arith.constant 0 : i32
    return %c0_i32 : i32
  }
  func.func @transform_1(%arg0: i32, %arg1: i32) -> (i32, i32, i32) {
    %c0_i32 = arith.constant 0 : i32
    %c0_i32_0 = arith.constant 0 : i32
    return %arg0, %c0_i32, %arg1 : i32, i32, i32
  }
  func.func @transform_2(%arg0: i32, %arg1: i32) -> (i32, i32) {
    %c0_i32 = arith.constant 0 : i32
    return %arg0, %arg1 : i32, i32
  }
}

</mosaic_0001>

<bundles_post_ra>
// kernel: tpu_custom_call.1
= control target key start
LH: loop header
LB: loop body
LE: loop exit
PB: predicated region body
PF: predicated region fallthrough
CT: control target
= control target key end

     0   :  { %s766_s0 = inlined_call_operand.hbm [shape: f32[2], index: 0, kind: input, shape index: {}]   ;;  %s767_s1 = inlined_call_operand.hbm [shape: f32[2,4,256], index: 1, kind: input, shape index: {}]   ;;  %s768_s2 = inlined_call_operand.hbm [shape: f32[2,256], index: 2, kind: output, shape index: {}]  }
   0x1   :  { %769 = sst [smem:[#allocation11_spill]] %s766_s0 }
   0x2   :  { %7 = vsyncpa [#allocation5], 0 }
   0x3   :  { %8 = vsyncpa [#allocation3], 0 }
   0x4   :  { %10 = vsyncpa [#allocation3 + $0x1], 0 }
   0x5   :  { %11 = vsyncpa [#allocation4], 0 }
   0x6   :  { %13 = vsyncpa [#allocation4 + $0x1], 0  ;;  %s610_s9 = smov 0   ;;  %s612_s10 = smov 0  }
   0x7   :  { %s614_s11 = smov 0   ;;  %s616_s12 = smov 0  }
   0x8   :  { %s618_s13 = smov 0   ;;  %s620_s14 = smov 0  }
   0x9 LB: > { %s362_s15 = sadd.s32 4294967295, %s587_s14   ;;  %s363_s16 = sadd.s32 4294967294, %s587_s14   ;;  %s587_s14 = sphi %s620_s14, %s19_s14   ;;  %s583_s13 = sphi %s618_s13, %s783_s13   ;;  %s579_s12 = sphi %s616_s12, %s782_s12   ;;  %s575_s11 = sphi %s614_s11, %s781_s11   ;;  %s571_s10 = sphi %s612_s10, %s780_s10   ;;  %s567_s9 = sphi %s610_s9, %s779_s9  }
   0xa   : > { %s61_s17 = sadd.s32 1, %s575_s11  ;;  %p68_p0 = scmp.ne.s32.totalorder %s575_s11, %s571_s10 }
   0xb   : > { %p69_p1 = scmp.eq.s32.totalorder %s587_s14, 0  ;;  %p74_p2 = scmp.ne.s32.totalorder %s571_s10, %s567_s9 }
   0xc   : > { %p648_p3 = scmp.eq.s32.totalorder %s362_s15, 0  ;;  %p100_p4 = scmp.eq.s32.totalorder %s362_s15, 1 }
   0xd   : > { %p70_p5 = por %p69_p1, %p68_p0  ;;  %p106_p6 = scmp.eq.s32.totalorder %s363_s16, 1 }
   0xe   : > { %p654_p7 = por %p648_p3, %p74_p2  ;;  %p658_p8 = por %p100_p4, %p68_p0 }
   0xf   : > { %p662_p9 = por %p106_p6, %p74_p2  ;;  %p364_p10 = scmp.ge.s32.totalorder %s587_s14, 1 }
  0x10   : > { %p113_p11 = scmp.lt.s32.totalorder %s587_s14, 3  ;;  %p401_p1 = scmp.lt.s32.totalorder %s587_s14, 2 }
  0x11   : > { %s773_s21 = scalar_select %p662_p9, 1, 0 }
  0x12   : > { %p669_p13 = pnand %p364_p10, %p113_p11  ;;  %s135_s23 = sand.u32 1, %s575_s11  }
  0x13   : > { %p677_p2 = pnand %p401_p1, %p70_p5  ;;  %s28_s25 = sadd.s32 1, %s583_s13 }
  0x14   : > { %p388_p0 = pneg %p669_p13  ;;  %s367_s26 = sshll.u32 %s135_s23, 3 }
  0x15   : > { %p29_p6 = scmp.ge.s32.totalorder %s28_s25, 2  ;;  %s589_s27 = smov [#allocation2]  }
  0x16   : > { %p389_p4 = pnand %p388_p0, %p648_p3  ;;  %s776_s0 = sld [smem:[#allocation11_spill]] }
  0x17   : > { %s785_s25 = smov (%p29_p6, %s28_s25), 0  ;;  %s368_s30 = sshll.u32 %s583_s13, 6 }
  0x18   : > { %s57_s3 = ssub.s32 %s583_s13, %s785_s25  ;;  %s147_s6 = scalar_lea.hbm %s767_s1, %s368_s30 }
  0x19   : > { %p59_p5 = scmp.eq.s32.totalorder %s57_s3, 0  ;;  %s139_s7 = scalar_lea.vmem [#allocation6], %s367_s26 }
  0x1a   : > { %s148_s8 = sshll.u32 %s139_s7, 4  ;;  %s136_s16 = scalar_lea.sflag [#allocation3], %s135_s23  ;;  %s149_s8 = int_to_ptr.vmem [resolvable:$true] %s148_s8 }
  0x1b   : > { %s698_s15 = scalar_select %p59_p5, %s575_s11, %s61_s17  }
  0x1c   : > { %391 = dma.hbm_to_smem (!%p389_p4), %s776_s0, 16, %s589_s27, [#allocation5]  }
  0x1d   : > { %p477_p10 = pneg %p677_p2  ;;  %s488_s27 = scalar_lea.vmem %s149_s8, 128 }
  0x1e   : > { %p489_p11 = scmp.ne.s32.totalorder %s149_s8, %s488_s27  ;;  %s590_s28 = smov [#allocation6]  }
  0x1f   : > { %s493_s29 = sshll.u32 %s590_s28, 4  ;;  %s494_s29 = int_to_ptr.vmem [resolvable:$false] %s493_s29 }
  0x20   : > { %p491_p1 = pnand %p489_p11, %p477_p10  ;;  %s495_s0 = scalar_lea.vmem %s494_s29, 256 }
  0x21   : > { %p496_p4 = scmp.lt.s32.totalorder %s149_s8, %s494_s29  ;;  %p497_p6 = scmp.lt.s32.totalorder %s495_s0, %s488_s27 }
  0x22   : > { %p492_p0 = pneg %p491_p1 }
  0x23   : > { %p498_p12 = por %p497_p6, %p496_p4 }
  0x25   : > { %p499_p9 = pnand %p498_p12, %p492_p0 }
  0x27   : > { %502 = shalt.err (!%p499_p9)
}
  0x28   : > { %s591_s26 = smov 128   ;;  %s592_s17 = smov 64  }
  0x29   : > { %s593_s30 = smov 4   ;;  %160 = sbr.rel (%p669_p13) target bundleno = 118 (0x76), region = 28 }
  0x2a   : > { %395 = dma.hbm_to_vmem [thread:$0]  (!%p677_p2), %s147_s6, 128, %s149_s8, %s136_s16, %s591_s26, %s592_s17, %s593_s30  }
  0x2e   : > { %554 = dma.done.wait (%p648_p3), [#allocation5], 16  }
  0x2f   : > { %556 = vsyncadd (%p648_p3), [#allocation5], 4294967280  ;;  %s711_s0 = sand.u32 1, %s571_s10  }
  0x30   : > { %s371_s23 = sshll.u32 %s711_s0, 3  ;;  %s167_s3 = scalar_lea.sflag [#allocation3], %s711_s0 }
  0x31   : > { %s170_s4 = scalar_lea.vmem [#allocation6], %s371_s23 }
  0x32   : > { %558 = dma.done.wait (%p654_p7), %s167_s3, 128  }
  0x33   : > { %560 = vsyncadd (%p654_p7), %s167_s3, 4294967168 }
  0x34   : > { %175 = sfence }
  0x35   : > { %v195_v0 = vld [vmem:[%s170_s4] sm:$0xf]  ;;  %vm197_vm0 = vcmask 1043456   ;;  %v196_v1 = vld [vmem:[%s170_s4 + $0x4] sm:$0xf]  ;;  %s193_s18 = sld [smem:[#allocation2]] }
  0x36   : > { %v198_v2 = vsel %vm197_vm0, %v195_v0, 0.0  ;;  %v205_v4 = vsel %vm197_vm0, %v196_v1, 0.0  ;;  %v212_v5 = vsel %vm197_vm0, %v195_v0, -inf  ;;  %v219_v6 = vsel %vm197_vm0, %v196_v1, -inf  ;;  %s373_s22 = sld [smem:[#allocation2 + $0x1]]  ;;  %s372_s19 = sshll.u32 %s711_s0, 1 }
  0x37   : > { %v199_v3 = vrot.slane %v198_v2, 4  ;;  %v206_v7 = vrot.slane %v205_v4, 4  ;;  %v213_v8 = vrot.slane %v212_v5, 4  ;;  %v220_v9 = vrot.slane %v219_v6, 4  ;;  %s191_s24 = scalar_lea.vmem [#allocation7], %s372_s19  ;;  %s377_s6 = sshll.u32 %s579_s12, 5 }
  0x38   : > { %s268_s5 = sshll.u32 %s191_s24, 4  ;;  %vm248_vm1 = vcmask 1041409   ;;  %s266_s16 = scalar_lea.hbm %s768_s2, %s377_s6  ;;  %s721_s5 = int_to_ptr.vmem [resolvable:$true] %s268_s5 }
  0x39   : > { %v200_v10 = vadd.f32 %v199_v3, %v198_v2  ;;  %v207_v11 = vadd.f32 %v206_v7, %v205_v4  ;;  %v214_v12 = vmax.f32 %v212_v5, %v213_v8  ;;  %v221_v13 = vmax.f32 %v219_v6, %v220_v9  ;;  %s253_s27 = scalar_lea.sflag [#allocation4], %s711_s0  ;;  %s503_s28 = scalar_lea.vmem %s721_s5, 32 }
  0x3a   : > { %p504_p3 = scmp.ne.s32.totalorder %s721_s5, %s503_s28  ;;  %s594_s12 = smov [#allocation7]  }
  0x3b   : > { %v201_v14 = vrot.slane %v200_v10, 2  ;;  %v208_v15 = vrot.slane %v207_v11, 2  ;;  %v215_v16 = vrot.slane %v214_v12, 2  ;;  %v222_v17 = vrot.slane %v221_v13, 2  ;;  %s507_s29 = sshll.u32 %s594_s12, 4  ;;  %s508_s29 = int_to_ptr.vmem [resolvable:$false] %s507_s29 }
  0x3c   : > { %v226_v26 = vstv %s193_s18  ;;  %v229_v28 = vstv %s373_s22  ;;  %p505_p7 = pnand %p504_p3, %p658_p8  ;;  %s509_s26 = scalar_lea.vmem %s508_s29, 64 }
  0x3d   : > { %v202_v18 = vadd.f32 %v201_v14, %v200_v10  ;;  %v209_v19 = vadd.f32 %v208_v15, %v207_v11  ;;  %v216_v20 = vmax.f32 %v214_v12, %v215_v16  ;;  %v223_v21 = vmax.f32 %v221_v13, %v222_v17  ;;  %p510_p12 = scmp.lt.s32.totalorder %s721_s5, %s508_s29  ;;  %p511_p13 = scmp.lt.s32.totalorder %s509_s26, %s503_s28 }
  0x3e   : > { %p506_p9 = pneg %p505_p7 }
  0x3f   : > { %v203_v22 = vrot.slane %v202_v18, 1  ;;  %v210_v23 = vrot.slane %v209_v19, 1  ;;  %v217_v24 = vrot.slane %v216_v20, 1  ;;  %v224_v25 = vrot.slane %v223_v21, 1  ;;  %p512_p2 = por %p511_p13, %p510_p12 }
  0x41   : > { %v204_v27 = vadd.f32 %v203_v22, %v202_v18  ;;  %v211_v29 = vadd.f32 %v210_v23, %v209_v19  ;;  %v218_v30 = vmax.f32 %v216_v20, %v217_v24  ;;  %v225_v31 = vmax.f32 %v223_v21, %v224_v25  ;;  %p513_p5 = pnand %p512_p2, %p506_p9 }
  0x43   : > { %v227_v32 = vmul.f32 %v226_v26, %v204_v27  ;;  %v228_v33 = vmul.f32 %v226_v26, %v211_v29  ;;  %v230_v34 = vmul.f32 %v229_v28, %v218_v30  ;;  %v231_v35 = vmul.f32 %v229_v28, %v225_v31 }
  0x45   : > { %v232_v36 = vadd.f32 %v230_v34, %v227_v32  ;;  %v233_v37 = vadd.f32 %v231_v35, %v228_v33 }
  0x47   : > { %v374_v38 = vmul.f32 -1.442695, %v232_v36  ;;  %v375_v39 = vmul.f32 -1.442695, %v233_v37 }
  0x49   : > { %456 = vpow2.f32 %v374_v38 }
  0x4a   : > { %458 = vpow2.f32 %v375_v39 }
  0x56   : > { %v457_v40 = vpop.eup %456 }
  0x57   : > { %v459_v41 = vpop.eup %458  ;;  %v240_v42 = vadd.f32 1.0, %v457_v40 }
  0x58   : > { %v241_v43 = vadd.f32 1.0, %v459_v41 }
  0x59   : > { %460 = vrcp.f32 %v240_v42 }
  0x5a   : > { %462 = vrcp.f32 %v241_v43 }
  0x66   : > { %v461_v44 = vpop.eup %460 }
  0x67   : > { %v463_v45 = vpop.eup %462 }
  0x68   : > { %v249_v46 = vsel %vm248_vm1, %v463_v45, %v461_v44 }
  0x69   : > { %251 = vst [vmem:[%s191_s24] sm:$0x3] %v249_v46 }
  0x6a   : > { %516 = shalt.err (!%p513_p5)
}
  0x6b   : > { %s517_s17 = scalar_lea.hbm %s266_s16, 32  ;;  %s521_s23 = scalar_lea.hbm %s768_s2, 64 }
  0x6c   : > { %p518_p10 = scmp.ne.s32.totalorder %s266_s16, %s517_s17  ;;  %p522_p0 = scmp.lt.s32.totalorder %s266_s16, %s768_s2 }
  0x6d   : > { %p523_p4 = scmp.lt.s32.totalorder %s521_s23, %s517_s17 }
  0x6e   : > { %p519_p11 = pnand %p518_p10, %p658_p8 }
  0x6f   : > { %p524_p6 = por %p523_p4, %p522_p0 }
  0x70   : > { %p520_p1 = pneg %p519_p11 }
  0x72   : > { %p525_p3 = pnand %p524_p6, %p520_p1 }
  0x74   : > { %528 = shalt.err (!%p525_p3)
}
  0x75   : > { %386 = dma.vmem_to_hbm [thread:$0]  (%p658_p8), %s721_s5, 32, %s266_s16, %s253_s27  }
  0x76 PF: > { %s280_s18 = sand.u32 1, %s567_s9   ;;  %p777_p7 = scmp.ne.s32.totalorder %s773_s21, 0 }
  0x77   : > { %p778_p9 = scmp.ge.s32.totalorder %s587_s14, 2  ;;  %s281_s22 = scalar_lea.sflag [#allocation4], %s280_s18 }
  0x79   : > { %p397_p12 = pnand %p778_p9, %p777_p7 }
  0x7b   : > { %p398_p13 = pneg %p397_p12 }
  0x7d   : > { %562 = dma.done.wait (%p398_p13), %s281_s22, 32  }
  0x7e   : > { %564 = vsyncadd (%p398_p13), %s281_s22, 4294967264  ;;  %s19_s14 = sadd.s32 1, %s587_s14   ;;  %s779_s9 = smov %s571_s10 }
  0x7f   : > { %p16_p2 = scmp.ge.s32.totalorder %s19_s14, 4   ;;  %s780_s10 = smov %s575_s11 }
  0x80   : > { %s781_s11 = smov %s698_s15  ;;  %s782_s12 = smov %s583_s13 }
  0x81   : > { %s783_s13 = smov %s785_s25  ;;  %18 = sbr.rel (!%p16_p2) target bundleno = 9 (0x9), region = 78 }
  0x86   :  { %286 = vsyncpa [#allocation3], 1 }
  0x87   :  { %288 = vsyncpa [#allocation3 + $0x1], 1 }
  0x88   :  { %289 = vsyncpa [#allocation4], 1 }
  0x89   :  { %291 = vsyncpa [#allocation4 + $0x1], 1 }
  0x8a   :  { %292 = vsyncpa [#allocation5], 1 }
  0x8b   :  { %294 = vsyncpa [#allocation5 + $0x1], 1 }

</bundles_post_ra>
